<compile_context>
chip_gen: v7x
topology: tpu7x:2x2x1
jax: 0.10.0
libtpu: 0.0.40
codegen_flags: <defaults>
</compile_context>

<pallas_src>
import functools

import jax
import jax.numpy as jnp
from jax.experimental import pallas as pl
from jax.experimental.pallas import tpu as pltpu


def _round_up(x, m):
    return ((x + m - 1) // m) * m


def _pick_tm(batch):
    """Pick the batch-tile height.

    Big tiles amortize the ~0.35 us per-grid-step overhead and keep DMAs near the HBM
    roofline, but we also keep >= 2 grid steps whenever the batch allows so that
    dimension_semantics=("parallel",) can shard steps across both v7x TensorCores.
    VMEM is nowhere near binding at these widths (x tile 512x64xf32 = 128 KiB,
    resident weights ~80 KiB), even under v7x's 32 MiB scoped default.
    """
    bp = _round_up(batch, 8)
    if bp <= 16:
        return bp                           # tiny batch: one tile
    if bp <= 1024:
        return _round_up((bp + 1) // 2, 8)  # exactly two tiles
    return 512                              # large batch: 512-row tiles


def _mlp_kernel(n_layers, scalar_head, *refs):
    """Fused MLP forward on one batch tile.

    refs = (x, w0, b0, ..., w_{L-1}, b_{L-1}, out).  Hidden layers run on the MXU with
    bf16 operands / f32 accumulation; bias add + ReLU stay f32 so the same kernel is
    safe on v5e.  A scalar value head (out_dim == 1) is a VPU multiply + cross-lane
    reduce against a pre-transposed (1, hidden) f32 weight row, so only a (tm, 1)
    column is stored to HBM instead of a zero-padded (tm, 128) slab.
    """
    x_ref = refs[0]
    out_ref = refs[-1]
    p = refs[1:-1]

    h = x_ref[...].astype(jnp.bfloat16)        # single cast, straight to MXU dtype
    for li in range(n_layers - 1):
        w_ref = p[2 * li]                      # bf16 (in, out) weights, VMEM-resident
        b_ref = p[2 * li + 1]                  # f32 (1, out) bias
        acc = jnp.dot(h, w_ref[...], preferred_element_type=jnp.float32) + b_ref[...]
        h = jnp.maximum(acc, 0.0).astype(jnp.bfloat16)

    w_ref = p[2 * (n_layers - 1)]
    b_ref = p[2 * (n_layers - 1) + 1]
    if scalar_head:
        # (tm, hidden) * (1, hidden) --lane reduce--> (tm, 1); all f32 elementwise.
        acc = jnp.sum(h.astype(jnp.float32) * w_ref[...], axis=-1, keepdims=True)
        out_ref[...] = (acc + b_ref[...]).astype(out_ref.dtype)
    else:
        acc = jnp.dot(h, w_ref[...], preferred_element_type=jnp.float32) + b_ref[...]
        out_ref[...] = acc.astype(out_ref.dtype)


def prepare_params(params):
    """One-time parameter preprocessing (hoisted out of the per-call wrapper).

    params: list of (W, b) with W (in, out) and b (1, out) (or (out,)), f32.
    Hidden / generic layers: W -> bf16 (halves weight DMA bytes, bf16 MXU operands),
    b -> f32.  A scalar output head (out == 1) is stored as an f32 (1, in) row for the
    in-kernel VPU multiply + reduce.
    """
    n_layers = len(params)
    out_dim = int(params[-1][0].shape[1])
    scalar_head = out_dim == 1
    layers = []
    for i, (w, b) in enumerate(params):
        w = jnp.asarray(w)
        b = jnp.asarray(b).reshape(1, -1).astype(jnp.float32)
        if scalar_head and i == n_layers - 1:
            layers.append((jnp.asarray(w, jnp.float32).T, b))   # (1, in) f32 row
        else:
            layers.append((w.astype(jnp.bfloat16), b))
    return {"layers": layers, "out_dim": out_dim, "scalar_head": scalar_head}


def basic_net_critic_forward(x, params, *, tm=None):
    """Fused BasicNetCritic forward.  Returns f32 (batch, out_dim).

    `params` is either the raw [(W, b), ...] list or the dict from prepare_params();
    preparing once outside the hot loop avoids re-casting weights on every call.
    """
    prepared = params if isinstance(params, dict) else prepare_params(params)
    layers = prepared["layers"]
    out_dim = prepared["out_dim"]
    scalar_head = prepared["scalar_head"]
    n_layers = len(layers)
    batch, in_dim = x.shape

    if tm is None:
        tm = _pick_tm(batch)
    batch_p = _round_up(batch, tm)
    if batch_p != batch:
        # TODO(synk): for very large ragged batches a masked last tile would avoid this
        # extra HBM copy of x; with the adaptive tm the padding is small.
        x = jnp.pad(x, ((0, batch_p - batch), (0, 0)))

    flat_params = []
    in_specs = [pl.BlockSpec((tm, in_dim), lambda i: (i, 0))]   # batch-tiled input
    for w, b in layers:
        flat_params.extend([w, b])
        # Constant index_map -> weights/biases stay VMEM-resident across grid steps.
        # (If the MLP ever grows to multi-MiB weights, consider
        #  pipeline_mode=pl.Buffered(1) here and/or raising vmem_limit_bytes on v7x.)
        in_specs.append(pl.BlockSpec(w.shape, lambda i: (0, 0)))
        in_specs.append(pl.BlockSpec(b.shape, lambda i: (0, 0)))

    flops = 2 * batch_p * sum(int(w.size) for w, _ in layers)
    bytes_accessed = (batch_p * in_dim * x.dtype.itemsize
                      + sum(int(w.size) * w.dtype.itemsize
                            + int(b.size) * b.dtype.itemsize for w, b in layers)
                      + batch_p * out_dim * 4)

    kernel = functools.partial(_mlp_kernel, n_layers, scalar_head)

    out = pl.pallas_call(
        kernel,
        out_shape=jax.ShapeDtypeStruct((batch_p, out_dim), jnp.float32),
        grid=(batch_p // tm,),
        in_specs=in_specs,
        out_specs=pl.BlockSpec((tm, out_dim), lambda i: (i, 0)),
        compiler_params=pltpu.CompilerParams(
            dimension_semantics=("parallel",)),
        cost_estimate=pl.CostEstimate(flops=flops, transcendentals=0,
                                      bytes_accessed=bytes_accessed),
    )(x, *flat_params)

    return out[:batch]


def init_params(key, input_size, hidden_sizes, output_size):
    """Deterministic PyTorch-style init: U(-1/sqrt(fan_in), 1/sqrt(fan_in))."""
    dims = [input_size] + list(hidden_sizes) + [output_size]
    params = []
    for i in range(len(dims) - 1):
        fan_in, fan_out = dims[i], dims[i + 1]
        key, kw, kb = jax.random.split(key, 3)
        bound = 1.0 / jnp.sqrt(fan_in)
        w = jax.random.uniform(kw, (fan_in, fan_out), jnp.float32, -bound, bound)
        b = jax.random.uniform(kb, (1, fan_out), jnp.float32, -bound, bound)
        params.append((w, b))
    return params


def reference_forward(x, params):
    """Reference mirroring the kernel numerics (bf16 MXU operands, f32 accumulate,
    f32 value head)."""
    n = len(params)
    h = x.astype(jnp.float32)
    for i, (w, b) in enumerate(params):
        last = i == n - 1
        if last and w.shape[1] == 1:
            h = jnp.dot(h.astype(jnp.bfloat16).astype(jnp.float32),
                        w.astype(jnp.float32),
                        precision=jax.lax.Precision.HIGHEST) + b
        else:
            h = jnp.dot(h.astype(jnp.bfloat16), w.astype(jnp.bfloat16),
                        preferred_element_type=jnp.float32) + b
            if not last:
                h = jnp.maximum(h, 0.0)
    return h


if __name__ == "__main__":
    key = jax.random.PRNGKey(0)

    # Small, MXU/lane-friendly critic shapes: obs features -> scalar value.
    batch = 256
    input_size = 64
    hidden_sizes = [128, 128]
    output_size = 1

    key, kx = jax.random.split(key)
    x = jax.random.normal(kx, (batch, input_size), jnp.float32)
    params = init_params(key, input_size, hidden_sizes, output_size)
    prepared = prepare_params(params)      # hoisted one-time weight preprocessing

    out = basic_net_critic_forward(x, prepared)
    out = jax.block_until_ready(out)

    ref = reference_forward(x, params)
    assert out.shape == (batch, output_size)
    assert jnp.allclose(out, ref, atol=2e-3, rtol=2e-3), "mismatch vs reference"

    print("KERNEL_OK")
</pallas_src>

<mosaic_0001>
module attributes {stable_mosaic.version = 11 : i64} {
  func.func @_mlp_kernel(%arg0: i32, %arg1: memref<128x64xf32, #tpu.memory_space<vmem>>, %arg2: memref<64x128xbf16, #tpu.memory_space<vmem>>, %arg3: memref<1x128xf32, #tpu.memory_space<vmem>>, %arg4: memref<128x128xbf16, #tpu.memory_space<vmem>>, %arg5: memref<1x128xf32, #tpu.memory_space<vmem>>, %arg6: memref<1x128xf32, #tpu.memory_space<vmem>>, %arg7: memref<1x1xf32, #tpu.memory_space<vmem>>, %arg8: memref<128x1xf32, #tpu.memory_space<vmem>>) attributes {dimension_semantics = [#tpu.dimension_semantics<parallel>], iteration_bounds = array<i64: 2>, scalar_prefetch = 0 : i64, scratch_operands = 0 : i64, tpu.core_type = #tpu.core_type<tc>, window_params = [{transform_indices = @transform_0, window_bounds = array<i64: 128, 64>}, {pipeline_mode = #tpu.pipeline_mode<synchronous>, transform_indices = @transform_1, window_bounds = array<i64: 64, 128>}, {pipeline_mode = #tpu.pipeline_mode<synchronous>, transform_indices = @transform_2, window_bounds = array<i64: 1, 128>}, {pipeline_mode = #tpu.pipeline_mode<synchronous>, transform_indices = @transform_3, window_bounds = array<i64: 128, 128>}, {pipeline_mode = #tpu.pipeline_mode<synchronous>, transform_indices = @transform_4, window_bounds = array<i64: 1, 128>}, {pipeline_mode = #tpu.pipeline_mode<synchronous>, transform_indices = @transform_5, window_bounds = array<i64: 1, 128>}, {pipeline_mode = #tpu.pipeline_mode<synchronous>, transform_indices = @transform_6, window_bounds = array<i64: 1, 1>}, {transform_indices = @transform_7, window_bounds = array<i64: 128, 1>}]} {
    %c0 = arith.constant 0 : index
    %c0_0 = arith.constant 0 : index
    %0 = vector.load %arg1[%c0, %c0_0] : memref<128x64xf32, #tpu.memory_space<vmem>>, vector<128x64xf32>
    %1 = arith.truncf %0 : vector<128x64xf32> to vector<128x64xbf16>
    %c0_1 = arith.constant 0 : index
    %c0_2 = arith.constant 0 : index
    %2 = vector.load %arg2[%c0_1, %c0_2] : memref<64x128xbf16, #tpu.memory_space<vmem>>, vector<64x128xbf16>
    %cst = arith.constant dense<0.000000e+00> : vector<128x128xf32>
    %3 = tpu.matmul %1, %2, %cst {dimension_numbers = #tpu.dot_dimension_numbers<[1], [0], [0], [1], [0, 0, 1, 1], [], []>} : vector<128x64xbf16>, vector<64x128xbf16>, vector<128x128xf32> -> vector<128x128xf32>
    %c0_3 = arith.constant 0 : index
    %c0_4 = arith.constant 0 : index
    %4 = vector.load %arg3[%c0_3, %c0_4] : memref<1x128xf32, #tpu.memory_space<vmem>>, vector<1x128xf32>
    %5 = vector.broadcast %4 : vector<1x128xf32> to vector<128x128xf32>
    %6 = arith.addf %3, %5 : vector<128x128xf32>
    %cst_5 = arith.constant 0.000000e+00 : f32
    %7 = vector.broadcast %cst_5 : f32 to vector<128x128xf32>
    %8 = arith.maximumf %6, %7 : vector<128x128xf32>
    %9 = arith.truncf %8 : vector<128x128xf32> to vector<128x128xbf16>
    %c0_6 = arith.constant 0 : index
    %c0_7 = arith.constant 0 : index
    %10 = vector.load %arg4[%c0_6, %c0_7] : memref<128x128xbf16, #tpu.memory_space<vmem>>, vector<128x128xbf16>
    %cst_8 = arith.constant dense<0.000000e+00> : vector<128x128xf32>
    %11 = tpu.matmul %9, %10, %cst_8 {dimension_numbers = #tpu.dot_dimension_numbers<[1], [0], [0], [1], [0, 0, 1, 1], [], []>} : vector<128x128xbf16>, vector<128x128xbf16>, vector<128x128xf32> -> vector<128x128xf32>
    %c0_9 = arith.constant 0 : index
    %c0_10 = arith.constant 0 : index
    %12 = vector.load %arg5[%c0_9, %c0_10] : memref<1x128xf32, #tpu.memory_space<vmem>>, vector<1x128xf32>
    %13 = vector.broadcast %12 : vector<1x128xf32> to vector<128x128xf32>
    %14 = arith.addf %11, %13 : vector<128x128xf32>
    %cst_11 = arith.constant 0.000000e+00 : f32
    %15 = vector.broadcast %cst_11 : f32 to vector<128x128xf32>
    %16 = arith.maximumf %14, %15 : vector<128x128xf32>
    %17 = arith.truncf %16 : vector<128x128xf32> to vector<128x128xbf16>
    %18 = arith.extf %17 : vector<128x128xbf16> to vector<128x128xf32>
    %c0_12 = arith.constant 0 : index
    %c0_13 = arith.constant 0 : index
    %19 = vector.load %arg6[%c0_12, %c0_13] : memref<1x128xf32, #tpu.memory_space<vmem>>, vector<1x128xf32>
    %20 = vector.broadcast %19 : vector<1x128xf32> to vector<128x128xf32>
    %21 = arith.mulf %18, %20 : vector<128x128xf32>
    %cst_14 = arith.constant dense<0.000000e+00> : vector<128xf32>
    %22 = vector.multi_reduction <add>, %21, %cst_14 [1] : vector<128x128xf32> to vector<128xf32>
    %23 = vector.shape_cast %22 : vector<128xf32> to vector<128x1xf32>
    %c0_15 = arith.constant 0 : index
    %c0_16 = arith.constant 0 : index
    %24 = vector.load %arg7[%c0_15, %c0_16] : memref<1x1xf32, #tpu.memory_space<vmem>>, vector<1x1xf32>
    %25 = vector.broadcast %24 : vector<1x1xf32> to vector<128x1xf32>
    %26 = arith.addf %23, %25 : vector<128x1xf32>
    %c0_17 = arith.constant 0 : index
    %c0_18 = arith.constant 0 : index
    %27 = vector.load %arg8[%c0_17, %c0_18] : memref<128x1xf32, #tpu.memory_space<vmem>>, vector<128x1xf32>
    tpu.vector_store %arg8[%c0_17, %c0_18], %26 {strides = array<i32>} : memref<128x1xf32, #tpu.memory_space<vmem>>, vector<128x1xf32>,
    return
  }
  func.func @transform_0(%arg0: i32) -> (i32, i32) {
    %c0_i32 = arith.constant 0 : i32
    %c0_i32_0 = arith.constant 0 : i32
    return %arg0, %c0_i32 : i32, i32
  }
  func.func @transform_1(%arg0: i32) -> (i32, i32) {
    %c0_i32 = arith.constant 0 : i32
    %c0_i32_0 = arith.constant 0 : i32
    %c0_i32_1 = arith.constant 0 : i32
    return %c0_i32, %c0_i32_0 : i32, i32
  }
  func.func @transform_2(%arg0: i32) -> (i32, i32) {
    %c0_i32 = arith.constant 0 : i32
    %c0_i32_0 = arith.constant 0 : i32
    %c0_i32_1 = arith.constant 0 : i32
    return %c0_i32, %c0_i32_0 : i32, i32
  }
  func.func @transform_3(%arg0: i32) -> (i32, i32) {
    %c0_i32 = arith.constant 0 : i32
    %c0_i32_0 = arith.constant 0 : i32
    %c0_i32_1 = arith.constant 0 : i32
    return %c0_i32, %c0_i32_0 : i32, i32
  }
  func.func @transform_4(%arg0: i32) -> (i32, i32) {
    %c0_i32 = arith.constant 0 : i32
    %c0_i32_0 = arith.constant 0 : i32
    %c0_i32_1 = arith.constant 0 : i32
    return %c0_i32, %c0_i32_0 : i32, i32
  }
  func.func @transform_5(%arg0: i32) -> (i32, i32) {
    %c0_i32 = arith.constant 0 : i32
    %c0_i32_0 = arith.constant 0 : i32
    %c0_i32_1 = arith.constant 0 : i32
    return %c0_i32, %c0_i32_0 : i32, i32
  }
  func.func @transform_6(%arg0: i32) -> (i32, i32) {
    %c0_i32 = arith.constant 0 : i32
    %c0_i32_0 = arith.constant 0 : i32
    %c0_i32_1 = arith.constant 0 : i32
    return %c0_i32, %c0_i32_0 : i32, i32
  }
  func.func @transform_7(%arg0: i32) -> (i32, i32) {
    %c0_i32 = arith.constant 0 : i32
    %c0_i32_0 = arith.constant 0 : i32
    return %arg0, %c0_i32 : i32, i32
  }
}

</mosaic_0001>

<bundles_post_ra>
// kernel: tpu_custom_call.1
= control target key start
LH: loop header
LB: loop body
LE: loop exit
PB: predicated region body
PF: predicated region fallthrough
CT: control target
= control target key end

     0   :  { %s1059_s26 = smov 0   ;;  %s1224_s0 = inlined_call_operand.vmem [shape: f32[256,64], index: 0, kind: input, shape index: {}]   ;;  %s1225_s1 = inlined_call_operand.vmem [shape: bf16[64,128], index: 1, kind: input, shape index: {}]   ;;  %s1226_s2 = inlined_call_operand.vmem [shape: f32[1,128], index: 2, kind: input, shape index: {}]   ;;  %s1227_s3 = inlined_call_operand.vmem [shape: bf16[128,128], index: 3, kind: input, shape index: {}]   ;;  %s1228_s4 = inlined_call_operand.vmem [shape: f32[1,128], index: 4, kind: input, shape index: {}]   ;;  %s1229_s5 = inlined_call_operand.vmem [shape: f32[1,128], index: 5, kind: input, shape index: {}]   ;;  %s1230_s6 = inlined_call_operand.<no memory space> [shape: f32[1,1], index: 6, kind: input, shape index: {}]   ;;  %s1231_s7 = inlined_call_operand.vmem [shape: f32[256,1], index: 7, kind: output, shape index: {}]  }
   0x1   :  { %v12_v0 = vstv %s1230_s6 }
   0x2   :  { %13 = vst [vmem:[#allocation2] sm:$0x1] %v12_v0 }
   0x3 LB: > { %s853_s27 = sadd.s32 4294967295, %s1014_s26   ;;  %p857_p0 = scmp.ge.s32.totalorder %s1014_s26, 1  ;;  %s1014_s26 = sphi %s1059_s26, %s19_s26  }
   0x4   : > { %p240_p1 = scmp.lt.s32.totalorder %s1014_s26, 3 }
   0x6   : > { %p241_p2 = pnand %p857_p0, %p240_p1 }
   0x7   : > { %v996_v1 = vld [vmem:[%s1225_s1] sm:$0xff] (!%p241_p2)   ;;  %s858_s6 = sshll.u32 (!%p241_p2), %s853_s27, 4  ;;  %v997_v2 = vld [vmem:[%s1225_s1 + $0x8] sm:$0xff] (!%p241_p2)   ;;  %v998_v3 = vld [vmem:[%s1225_s1 + $0x10] sm:$0xff] (!%p241_p2)   ;;  %vm348_vm0 = vcmask (!%p241_p2), 523264   ;;  %vm780_vm1 = vcmask (!%p241_p2), 7168  }
   0x8   : > { %244 = sbr.rel (%p241_p2) target bundleno = 644 (0x284), region = 48  ;;  %p273_p3 = scmp.lt.s32.totalorder (!%p241_p2), %s858_s6, 31  ;;  %916 = vmatprep.subr.bf16.mxu0 (!%p241_p2), %v996_v1  ;;  %v1000_v4 = vld [vmem:[%s1227_s3] sm:$0xff] (!%p241_p2)   ;;  %v1001_v5 = vld [vmem:[%s1227_s3 + $0x8] sm:$0xff] (!%p241_p2)   ;;  %v999_v8 = vld [vmem:[%s1225_s1 + $0x18] sm:$0xff] (!%p241_p2)  }
   0x9   : > { %917 = vmatpush3.bf16.msra.mxu0 (!%p241_p2), %v996_v1  ;;  %972 = vmatprep.subr.bf16.mxu1 (!%p241_p2), %v1000_v4  ;;  %v1002_v10 = vld [vmem:[%s1227_s3 + $0x10] sm:$0xff] (!%p241_p2)   ;;  %v1003_v16 = vld [vmem:[%s1227_s3 + $0x18] sm:$0xff] (!%p241_p2)   ;;  %v1004_v20 = vld [vmem:[%s1227_s3 + $0x20] sm:$0xff] (!%p241_p2)  }
   0xa   : > { %918 = vmatprep.subr.bf16.mxu0 (!%p241_p2), %v997_v2  ;;  %980 = vmatpush3.bf16.msra.mxu1 (!%p241_p2), %v1000_v4  ;;  %v1005_v25 = vld [vmem:[%s1227_s3 + $0x28] sm:$0xff] (!%p241_p2)   ;;  %v1006_v35 = vld [vmem:[%s1227_s3 + $0x30] sm:$0xff] (!%p241_p2)   ;;  %v1007_v36 = vld [vmem:[%s1227_s3 + $0x38] sm:$0xff] (!%p241_p2)  }
   0xb   : > { %973 = vmatprep.subr.bf16.mxu1 (!%p241_p2), %v1001_v5  ;;  %v862_v37 = vld [vmem:[%s1226_s2] ss:$0 sm:$0xff] (!%p241_p2) }
   0xd   : > { %919 = vmatpush3.bf16.msra.mxu0 (!%p241_p2), %v997_v2 }
   0xe   : > { %920 = vmatprep.subr.bf16.mxu0 (!%p241_p2), %v998_v3  ;;  %981 = vmatpush3.bf16.msra.mxu1 (!%p241_p2), %v1001_v5 }
   0xf   : > { %s1233_s6 = smov (!%p273_p3, %s858_s6), 31  ;;  %974 = vmatprep.subr.bf16.mxu1 %v1002_v10 }
  0x10   : > { %s859_s13 = sshll.u32 %s1233_s6, 3 }
  0x11   : > { %s1087_s16 = scalar_lea.vmem %s1224_s0, %s859_s13  ;;  %921 = vmatpush3.bf16.msra.mxu0 %v998_v3  ;;  %s1187_s20 = scalar_lea.vmem %s1231_s7, %s859_s13 }
  0x12   : > { %v285_v6 = vld [vmem:[%s1087_s16] sm:$0xff]  ;;  %v286_v7 = vld [vmem:[%s1087_s16 + $0x8] sm:$0xff]  ;;  %v287_v11 = vld [vmem:[%s1087_s16 + $0x10] sm:$0xff]  ;;  %922 = vmatprep.subr.bf16.mxu0 %v999_v8  ;;  %982 = vmatpush3.bf16.msra.mxu1 %v1002_v10 }
  0x13   : > { %v301_v9 = vpack.c.bf16 %v286_v7, %v285_v6  ;;  %v288_v12 = vld [vmem:[%s1087_s16 + $0x18] sm:$0xff]  ;;  %v289_v13 = vld [vmem:[%s1087_s16 + $0x20] sm:$0xff]  ;;  %v290_v14 = vld [vmem:[%s1087_s16 + $0x28] sm:$0xff]  ;;  %975 = vmatprep.subr.bf16.mxu1 %v1003_v16 }
  0x14   : > { %v302_v15 = vpack.c.bf16 %v288_v12, %v287_v11  ;;  %v303_v17 = vpack.c.bf16 %v290_v14, %v289_v13  ;;  %v291_v18 = vld [vmem:[%s1087_s16 + $0x30] sm:$0xff]  ;;  %v292_v19 = vld [vmem:[%s1087_s16 + $0x38] sm:$0xff]  ;;  %v293_v21 = vld [vmem:[%s1087_s16 + $0x40] sm:$0xff] }
  0x15   : > { %924 = vmatprep.mubr.msk.bf16.mxu0 %vm348_vm0, %v301_v9  ;;  %923 = vmatpush3.bf16.msra.mxu0 %v999_v8  ;;  %v294_v22 = vld [vmem:[%s1087_s16 + $0x48] sm:$0xff]  ;;  %v304_v23 = vpack.c.bf16 %v292_v19, %v291_v18  ;;  %v295_v26 = vld [vmem:[%s1087_s16 + $0x50] sm:$0xff]  ;;  %v296_v27 = vld [vmem:[%s1087_s16 + $0x58] sm:$0xff] }
  0x16   : > { %940 = vmatprep.subr.bf16.mxu0 %v1000_v4  ;;  %983 = vmatpush3.bf16.msra.mxu1 %v1003_v16  ;;  %v305_v24 = vpack.c.bf16 %v294_v22, %v293_v21  ;;  %v297_v28 = vld [vmem:[%s1087_s16 + $0x60] sm:$0xff]  ;;  %v298_v29 = vld [vmem:[%s1087_s16 + $0x68] sm:$0xff]  ;;  %v306_v30 = vpack.c.bf16 %v296_v27, %v295_v26  ;;  %v299_v32 = vld [vmem:[%s1087_s16 + $0x70] sm:$0xff] }
  0x17   : > { %976 = vmatprep.subr.bf16.mxu1 %v1004_v20  ;;  %v307_v31 = vpack.c.bf16 %v298_v29, %v297_v28  ;;  %v300_v33 = vld [vmem:[%s1087_s16 + $0x78] sm:$0xff] }
  0x18   : > { %925 = vmatmul.mubr.msk.bf16.vlgmr.msra.gmra.mrb[0].mxu0 %vm348_vm0, %v302_v15  ;;  %v308_v34 = vpack.c.bf16 %v300_v33, %v299_v32 }
  0x19   : > { %928 = vmatprep.mubr.msk.bf16.mxu0 %vm348_vm0, %v303_v17  ;;  %941 = vmatpush3.bf16.msra.mxu0 %v1000_v4 }
  0x1a   : > { %942 = vmatprep.subr.bf16.mxu0 %v1001_v5  ;;  %984 = vmatpush3.bf16.msra.mxu1 %v1004_v20 }
  0x1b   : > { %977 = vmatprep.subr.bf16.mxu1 %v1005_v25 }
  0x1d   : > { %943 = vmatpush3.bf16.msra.mxu0 %v1001_v5 }
  0x1e   : > { %944 = vmatprep.subr.bf16.mxu0 %v1002_v10  ;;  %985 = vmatpush3.bf16.msra.mxu1 %v1005_v25 }
  0x1f   : > { %978 = vmatprep.subr.bf16.mxu1 %v1006_v35 }
  0x20   : > { %929 = vmatmul.mubr.msk.bf16.gmra.mrb[4].mxu0 %vm348_vm0, %v304_v23 }
  0x21   : > { %932 = vmatprep.mubr.msk.bf16.mxu0 %vm348_vm0, %v305_v24  ;;  %945 = vmatpush3.bf16.msra.mxu0 %v1002_v10 }
  0x22   : > { %946 = vmatprep.subr.bf16.mxu0 %v1003_v16  ;;  %986 = vmatpush3.bf16.msra.mxu1 %v1006_v35 }
  0x23   : > { %979 = vmatprep.subr.bf16.mxu1 %v1007_v36 }
  0x25   : > { %947 = vmatpush3.bf16.msra.mxu0 %v1003_v16 }
  0x26   : > { %948 = vmatprep.subr.bf16.mxu0 %v1004_v20  ;;  %987 = vmatpush3.bf16.msra.mxu1 %v1007_v36 }
  0x28   : > { %933 = vmatmul.mubr.msk.bf16.gmra.mrb[8].mxu0 %vm348_vm0, %v306_v30  ;;  %v1143_v30 = vld [vmem:[%s1228_s4] ss:$0 sm:$0xff] }
  0x29   : > { %936 = vmatprep.mubr.msk.bf16.mxu0 %vm348_vm0, %v307_v31  ;;  %949 = vmatpush3.bf16.msra.mxu0 %v1004_v20 }
  0x2a   : > { %950 = vmatprep.subr.bf16.mxu0 %v1005_v25 }
  0x2d   : > { %951 = vmatpush3.bf16.msra.mxu0 %v1005_v25 }
  0x2e   : > { %952 = vmatprep.subr.bf16.mxu0 %v1006_v35 }
  0x30   : > { %937 = vmatmul.mubr.msk.bf16.gmra.mrb[12].mxu0 %vm348_vm0, %v308_v34 }
  0x31   : > { %953 = vmatpush3.bf16.msra.mxu0 %v1006_v35 }
  0x32   : > { %954 = vmatprep.subr.bf16.mxu0 %v1007_v36 }
  0x35   : > { %955 = vmatpush3.bf16.msra.mxu0 %v1007_v36 }
  0xeb   : > { %v926_v38 = vpop.f32.mrb[0].mxu0 }
  0xec   : > { %v416_v39 = vadd.f32 %v926_v38, %v862_v37  ;;  %v407_v40 = vpop.f32.mrb[1].mxu0 }
  0xed   : > { %v408_v41 = vadd.f32 %v862_v37, %v407_v40  ;;  %v927_v42 = vpop.f32.mrb[2].mxu0 }
  0xee   : > { %v419_v43 = vadd.f32 %v927_v42, %v862_v37  ;;  %v410_v44 = vpop.f32.mrb[3].mxu0  ;;  %v472_v46 = vmax.f32 %v416_v39, 0.0 }
  0xef   : > { %v411_v45 = vadd.f32 %v862_v37, %v410_v44  ;;  %v470_v48 = vmax.f32 %v408_v41, 0.0 }
  0xf0   : > { %v473_v47 = vmax.f32 %v419_v43, 0.0 }
  0xf1   : > { %v471_v49 = vmax.f32 %v411_v45, 0.0 }
  0xf2   : > { %v487_v50 = vpack.c.bf16 %v473_v47, %v472_v46  ;;  %v1152_v46 = vld [vmem:[%s1229_s5] ss:$0 sm:$0xff] }
  0xf3   : > { %v486_v51 = vpack.c.bf16 %v471_v49, %v470_v48  ;;  %v930_v52 = vpop.f32.mrb[4].mxu0 }
  0xf4   : > { %v432_v53 = vadd.f32 %v930_v52, %v862_v37  ;;  %v423_v54 = vpop.f32.mrb[5].mxu0 }
  0xf5   : > { %v424_v55 = vadd.f32 %v862_v37, %v423_v54  ;;  %v931_v56 = vpop.f32.mrb[6].mxu0  ;;  %956 = vmatprep.mubr.bf16.mxu0 %v486_v51 }
  0xf6   : > { %v435_v57 = vadd.f32 %v931_v56, %v862_v37  ;;  %v426_v58 = vpop.f32.mrb[7].mxu0  ;;  %957 = vmatmul.mubr.bf16.vlgmr.msra.gmra.mrb[16].mxu0 %v487_v50  ;;  %v476_v60 = vmax.f32 %v432_v53, 0.0 }
  0xf7   : > { %v427_v59 = vadd.f32 %v862_v37, %v426_v58  ;;  %v474_v62 = vmax.f32 %v424_v55, 0.0 }
  0xf8   : > { %v477_v61 = vmax.f32 %v435_v57, 0.0 }
  0xf9   : > { %v475_v63 = vmax.f32 %v427_v59, 0.0 }
  0xfa   : > { %v489_v0 = vpack.c.bf16 %v477_v61, %v476_v60 }
  0xfb   : > { %v934_v1 = vpop.f32.mrb[8].mxu0  ;;  %v488_v2 = vpack.c.bf16 %v475_v63, %v474_v62 }
  0xfc   : > { %v448_v3 = vadd.f32 %v934_v1, %v862_v37  ;;  %v439_v4 = vpop.f32.mrb[9].mxu0 }
  0xfd   : > { %v440_v5 = vadd.f32 %v862_v37, %v439_v4  ;;  %v935_v6 = vpop.f32.mrb[10].mxu0  ;;  %960 = vmatprep.mubr.bf16.mxu1 %v488_v2 }
  0xfe   : > { %v451_v7 = vadd.f32 %v935_v6, %v862_v37  ;;  %v442_v8 = vpop.f32.mrb[11].mxu0  ;;  %961 = vmatmul.mubr.bf16.vlgmr.msra.gmra.mrb[0].mxu1 %v489_v0  ;;  %v480_v10 = vmax.f32 %v448_v3, 0.0 }
  0xff   : > { %v443_v9 = vadd.f32 %v862_v37, %v442_v8  ;;  %v478_v12 = vmax.f32 %v440_v5, 0.0 }
 0x100   : > { %v481_v11 = vmax.f32 %v451_v7, 0.0 }
 0x101   : > { %v479_v13 = vmax.f32 %v443_v9, 0.0 }
 0x102   : > { %v491_v14 = vpack.c.bf16 %v481_v11, %v480_v10 }
 0x103   : > { %v490_v15 = vpack.c.bf16 %v479_v13, %v478_v12  ;;  %v938_v16 = vpop.f32.mrb[12].mxu0 }
 0x104   : > { %v464_v17 = vadd.f32 %v938_v16, %v862_v37  ;;  %v455_v18 = vpop.f32.mrb[13].mxu0 }
 0x105   : > { %v456_v19 = vadd.f32 %v862_v37, %v455_v18  ;;  %v939_v20 = vpop.f32.mrb[14].mxu0  ;;  %964 = vmatprep.mubr.bf16.mxu1 %v490_v15 }
 0x106   : > { %v467_v21 = vadd.f32 %v939_v20, %v862_v37  ;;  %v458_v22 = vpop.f32.mrb[15].mxu0  ;;  %965 = vmatmul.mubr.bf16.gmra.mrb[4].mxu1 %v491_v14  ;;  %v484_v24 = vmax.f32 %v464_v17, 0.0 }
 0x107   : > { %v459_v23 = vadd.f32 %v862_v37, %v458_v22  ;;  %v482_v26 = vmax.f32 %v456_v19, 0.0 }
 0x108   : > { %v485_v25 = vmax.f32 %v467_v21, 0.0 }
 0x109   : > { %v483_v27 = vmax.f32 %v459_v23, 0.0 }
 0x10a   : > { %v493_v28 = vpack.c.bf16 %v485_v25, %v484_v24 }
 0x10b   : > { %v492_v29 = vpack.c.bf16 %v483_v27, %v482_v26 }
 0x10d   : > { %968 = vmatprep.mubr.bf16.mxu1 %v492_v29 }
 0x10e   : > { %969 = vmatmul.mubr.bf16.gmra.mrb[8].mxu1 %v493_v28 }
 0x1c9   : > { %v958_v31 = vpop.f32.mrb[16].mxu0 }
 0x1ca   : > { %v608_v32 = vadd.f32 %v958_v31, %v1143_v30  ;;  %v599_v33 = vpop.f32.mrb[17].mxu0 }
 0x1cb   : > { %v600_v34 = vadd.f32 %v1143_v30, %v599_v33  ;;  %v959_v35 = vpop.f32.mrb[18].mxu0 }
 0x1cc   : > { %v611_v36 = vadd.f32 %v959_v35, %v1143_v30  ;;  %v602_v37 = vpop.f32.mrb[19].mxu0  ;;  %v664_v39 = vmax.f32 %v608_v32, 0.0 }
 0x1cd   : > { %v603_v38 = vadd.f32 %v1143_v30, %v602_v37  ;;  %v662_v41 = vmax.f32 %v600_v34, 0.0 }
 0x1ce   : > { %v665_v40 = vmax.f32 %v611_v36, 0.0 }
 0x1cf   : > { %v663_v42 = vmax.f32 %v603_v38, 0.0 }
 0x1d0   : > { %v679_v43 = vpack.c.bf16 %v665_v40, %v664_v39 }
 0x1d1   : > { %v678_v44 = vpack.c.bf16 %v663_v42, %v662_v41  ;;  %v962_v45 = vpop.f32.mrb[0].mxu1 }
 0x1d2   : > { %v624_v47 = vadd.f32 %v962_v45, %v1143_v30  ;;  %v615_v48 = vpop.f32.mrb[1].mxu1  ;;  %v688_v49 = vunpack.c.l.bf16 %v679_v43  ;;  %v689_v56 = vunpack.c.h.bf16 %v679_v43 }
 0x1d3   : > { %v616_v50 = vadd.f32 %v1143_v30, %v615_v48  ;;  %v963_v51 = vpop.f32.mrb[2].mxu1  ;;  %v686_v52 = vunpack.c.l.bf16 %v678_v44  ;;  %v687_v59 = vunpack.c.h.bf16 %v678_v44 }
 0x1d4   : > { %v627_v53 = vadd.f32 %v963_v51, %v1143_v30  ;;  %v618_v54 = vpop.f32.mrb[3].mxu1  ;;  %v711_v55 = vmul.f32 %v1152_v46, %v688_v49  ;;  %v668_v60 = vmax.f32 %v624_v47, 0.0  ;;  %v712_v1 = vmul.f32 %v1152_v46, %v689_v56 }
 0x1d5   : > { %v619_v57 = vadd.f32 %v1143_v30, %v618_v54  ;;  %v709_v58 = vmul.f32 %v1152_v46, %v686_v52  ;;  %v666_v62 = vmax.f32 %v616_v50, 0.0  ;;  %v710_v4 = vmul.f32 %v1152_v46, %v687_v59 }
 0x1d6   : > { %v669_v61 = vmax.f32 %v627_v53, 0.0  ;;  %729 = vadd.xlane.f32.xlu1 %v711_v55 }
 0x1d7   : > { %v667_v63 = vmax.f32 %v619_v57, 0.0  ;;  %725 = vadd.xlane.f32.xlu0 %v709_v58  ;;  %v885_v57 = vld [vmem:[#allocation2] ss:$0 sm:$0xff] }
 0x1d8   : > { %v681_v0 = vpack.c.bf16 %v669_v61, %v668_v60 }
 0x1d9   : > { %v680_v2 = vpack.c.bf16 %v667_v63, %v666_v62  ;;  %v966_v3 = vpop.f32.mrb[4].mxu1 }
 0x1da   : > { %v640_v5 = vadd.f32 %v966_v3, %v1143_v30  ;;  %v631_v6 = vpop.f32.mrb[5].mxu1  ;;  %731 = vadd.xlane.f32.xlu1 %v712_v1  ;;  %v693_v7 = vunpack.c.h.bf16 %v681_v0  ;;  %v692_v8 = vunpack.c.l.bf16 %v681_v0 }
 0x1db   : > { %v632_v9 = vadd.f32 %v1143_v30, %v631_v6  ;;  %v967_v10 = vpop.f32.mrb[6].mxu1  ;;  %727 = vadd.xlane.f32.xlu0 %v710_v4  ;;  %v691_v15 = vunpack.c.h.bf16 %v680_v2  ;;  %v690_v17 = vunpack.c.l.bf16 %v680_v2 }
 0x1dc   : > { %v643_v11 = vadd.f32 %v967_v10, %v1143_v30  ;;  %v634_v12 = vpop.f32.mrb[7].mxu1  ;;  %v716_v13 = vmul.f32 %v1152_v46, %v693_v7  ;;  %v715_v14 = vmul.f32 %v1152_v46, %v692_v8  ;;  %v672_v18 = vmax.f32 %v640_v5, 0.0 }
 0x1dd   : > { %v635_v16 = vadd.f32 %v1143_v30, %v634_v12  ;;  %v670_v20 = vmax.f32 %v632_v9, 0.0  ;;  %v714_v23 = vmul.f32 %v1152_v46, %v691_v15  ;;  %v713_v26 = vmul.f32 %v1152_v46, %v690_v17 }
 0x1de   : > { %v673_v19 = vmax.f32 %v643_v11, 0.0  ;;  %739 = vadd.xlane.f32.xlu1 %v716_v13 }
 0x1df   : > { %v671_v21 = vmax.f32 %v635_v16, 0.0  ;;  %737 = vadd.xlane.f32.xlu0 %v715_v14 }
 0x1e0   : > { %v683_v22 = vpack.c.bf16 %v673_v19, %v672_v18 }
 0x1e1   : > { %v682_v24 = vpack.c.bf16 %v671_v21, %v670_v20  ;;  %v970_v25 = vpop.f32.mrb[8].mxu1 }
 0x1e2   : > { %v656_v27 = vadd.f32 %v970_v25, %v1143_v30  ;;  %v647_v28 = vpop.f32.mrb[9].mxu1  ;;  %735 = vadd.xlane.f32.xlu1 %v714_v23  ;;  %v697_v29 = vunpack.c.h.bf16 %v683_v22  ;;  %v696_v31 = vunpack.c.l.bf16 %v683_v22 }
 0x1e3   : > { %v648_v32 = vadd.f32 %v1143_v30, %v647_v28  ;;  %v971_v33 = vpop.f32.mrb[10].mxu1  ;;  %733 = vadd.xlane.f32.xlu0 %v713_v26  ;;  %v695_v38 = vunpack.c.h.bf16 %v682_v24  ;;  %v694_v40 = vunpack.c.l.bf16 %v682_v24 }
 0x1e4   : > { %v659_v34 = vadd.f32 %v971_v33, %v1143_v30  ;;  %v650_v35 = vpop.f32.mrb[11].mxu1  ;;  %v720_v36 = vmul.f32 %v1152_v46, %v697_v29  ;;  %v719_v37 = vmul.f32 %v1152_v46, %v696_v31  ;;  %v676_v41 = vmax.f32 %v656_v27, 0.0 }
 0x1e5   : > { %v651_v39 = vadd.f32 %v1143_v30, %v650_v35  ;;  %v674_v43 = vmax.f32 %v648_v32, 0.0  ;;  %v718_v47 = vmul.f32 %v1152_v46, %v695_v38  ;;  %v717_v49 = vmul.f32 %v1152_v46, %v694_v40 }
 0x1e6   : > { %v677_v42 = vmax.f32 %v659_v34, 0.0  ;;  %747 = vadd.xlane.f32.xlu1 %v720_v36 }
 0x1e7   : > { %v675_v44 = vmax.f32 %v651_v39, 0.0  ;;  %745 = vadd.xlane.f32.xlu0 %v719_v37 }
 0x1e8   : > { %v685_v45 = vpack.c.bf16 %v677_v42, %v676_v41 }
 0x1e9   : > { %v684_v48 = vpack.c.bf16 %v675_v44, %v674_v43 }
 0x1ea   : > { %743 = vadd.xlane.f32.xlu1 %v718_v47  ;;  %v701_v53 = vunpack.c.h.bf16 %v685_v45  ;;  %v700_v54 = vunpack.c.l.bf16 %v685_v45 }
 0x1eb   : > { %741 = vadd.xlane.f32.xlu0 %v717_v49  ;;  %v699_v50 = vunpack.c.h.bf16 %v684_v48  ;;  %v698_v51 = vunpack.c.l.bf16 %v684_v48 }
 0x1ec   : > { %v724_v55 = vmul.f32 %v1152_v46, %v701_v53  ;;  %v723_v56 = vmul.f32 %v1152_v46, %v700_v54 }
 0x1ed   : > { %v722_v30 = vmul.f32 %v1152_v46, %v699_v50  ;;  %v721_v52 = vmul.f32 %v1152_v46, %v698_v51 }
 0x1ef   : > { %751 = vadd.xlane.f32.xlu1 %v722_v30  ;;  %749 = vadd.xlane.f32.xlu0 %v721_v52 }
 0x1f3   : > { %755 = vadd.xlane.f32.xlu1 %v724_v55  ;;  %753 = vadd.xlane.f32.xlu0 %v723_v56 }
 0x263   : > { %v730_v58 = vpop.xlane.xlu1 %729 }
 0x264   : > { %v766_v59 = vadd.f32 %v885_v57, %v730_v58  ;;  %v726_v60 = vpop.xlane.xlu0 %725 }
 0x265   : > { %v764_v46 = vadd.f32 %v885_v57, %v726_v60 }
 0x266   : > { %783 = vst.msk [vmem:[%s1187_s20 + $0x10] sm:$0xff] %vm780_vm1, %v766_v59 }
 0x267   : > { %781 = vst.msk [vmem:[%s1187_s20] sm:$0xff] %vm780_vm1, %v764_v46  ;;  %v732_v61 = vpop.xlane.xlu1 %731 }
 0x268   : > { %v767_v62 = vadd.f32 %v885_v57, %v732_v61  ;;  %v728_v63 = vpop.xlane.xlu0 %727 }
 0x269   : > { %v765_v0 = vadd.f32 %v885_v57, %v728_v63 }
 0x26a   : > { %784 = vst.msk [vmem:[%s1187_s20 + $0x18] sm:$0xff] %vm780_vm1, %v767_v62 }
 0x26b   : > { %782 = vst.msk [vmem:[%s1187_s20 + $0x8] sm:$0xff] %vm780_vm1, %v765_v0  ;;  %v740_v1 = vpop.xlane.xlu1 %739 }
 0x26c   : > { %v771_v2 = vadd.f32 %v885_v57, %v740_v1  ;;  %v738_v3 = vpop.xlane.xlu0 %737 }
 0x26d   : > { %v770_v4 = vadd.f32 %v885_v57, %v738_v3 }
 0x26e   : > { %788 = vst.msk [vmem:[%s1187_s20 + $0x38] sm:$0xff] %vm780_vm1, %v771_v2 }
 0x26f   : > { %787 = vst.msk [vmem:[%s1187_s20 + $0x30] sm:$0xff] %vm780_vm1, %v770_v4  ;;  %v736_v5 = vpop.xlane.xlu1 %735 }
 0x270   : > { %v769_v6 = vadd.f32 %v885_v57, %v736_v5  ;;  %v734_v7 = vpop.xlane.xlu0 %733 }
 0x271   : > { %v768_v8 = vadd.f32 %v885_v57, %v734_v7 }
 0x272   : > { %786 = vst.msk [vmem:[%s1187_s20 + $0x28] sm:$0xff] %vm780_vm1, %v769_v6 }
 0x273   : > { %785 = vst.msk [vmem:[%s1187_s20 + $0x20] sm:$0xff] %vm780_vm1, %v768_v8  ;;  %v748_v9 = vpop.xlane.xlu1 %747 }
 0x274   : > { %v775_v10 = vadd.f32 %v885_v57, %v748_v9  ;;  %v746_v11 = vpop.xlane.xlu0 %745 }
 0x275   : > { %v774_v12 = vadd.f32 %v885_v57, %v746_v11 }
 0x276   : > { %792 = vst.msk [vmem:[%s1187_s20 + $0x58] sm:$0xff] %vm780_vm1, %v775_v10 }
 0x277   : > { %791 = vst.msk [vmem:[%s1187_s20 + $0x50] sm:$0xff] %vm780_vm1, %v774_v12  ;;  %v744_v13 = vpop.xlane.xlu1 %743 }
 0x278   : > { %v773_v14 = vadd.f32 %v885_v57, %v744_v13  ;;  %v742_v15 = vpop.xlane.xlu0 %741 }
 0x279   : > { %v772_v16 = vadd.f32 %v885_v57, %v742_v15 }
 0x27a   : > { %790 = vst.msk [vmem:[%s1187_s20 + $0x48] sm:$0xff] %vm780_vm1, %v773_v14 }
 0x27b   : > { %789 = vst.msk [vmem:[%s1187_s20 + $0x40] sm:$0xff] %vm780_vm1, %v772_v16 }
 0x27c   : > { %v752_v17 = vpop.xlane.xlu1 %751  ;;  %v750_v18 = vpop.xlane.xlu0 %749 }
 0x27d   : > { %v777_v19 = vadd.f32 %v885_v57, %v752_v17  ;;  %v776_v20 = vadd.f32 %v885_v57, %v750_v18 }
 0x27f   : > { %794 = vst.msk [vmem:[%s1187_s20 + $0x68] sm:$0xff] %vm780_vm1, %v777_v19  ;;  %793 = vst.msk [vmem:[%s1187_s20 + $0x60] sm:$0xff] %vm780_vm1, %v776_v20 }
 0x280   : > { %v756_v21 = vpop.xlane.xlu1 %755  ;;  %v754_v22 = vpop.xlane.xlu0 %753 }
 0x281   : > { %v779_v23 = vadd.f32 %v885_v57, %v756_v21  ;;  %v778_v24 = vadd.f32 %v885_v57, %v754_v22 }
 0x283   : > { %796 = vst.msk [vmem:[%s1187_s20 + $0x78] sm:$0xff] %vm780_vm1, %v779_v23  ;;  %795 = vst.msk [vmem:[%s1187_s20 + $0x70] sm:$0xff] %vm780_vm1, %v778_v24 }
 0x284 PF: > { %s19_s26 = sadd.s32 1, %s1014_s26  }
 0x285   : > { %p16_p4 = scmp.ge.s32.totalorder %s19_s26, 4  }
 0x287   :  { %18 = sbr.rel (!%p16_p4) target bundleno = 3 (0x3), region = 78 }

</bundles_post_ra>
